<compile_context>
chip_gen: v7x
topology: tpu7x:2x2x1
jax: 0.10.0
libtpu: 0.0.40
codegen_flags: <defaults>
</compile_context>

<pallas_src>
import functools

import jax
import jax.numpy as jnp
from jax import lax
from jax.experimental import pallas as pl
from jax.experimental.pallas import tpu as pltpu

LANES = 128
# ~1 MiB (f32, lane-padded) per input block; 2 inputs x 2 pipeline buffers
# = ~4 MiB of VMEM, comfortably inside every generation's scoped limit.
TARGET_BLOCK_BYTES = 1 << 20
# Last dims wider than this fall back to the flat (rows, 128) view so a
# single row-aligned block can never blow the VMEM budget.
MAX_BLOCK_LANES = 4096


def _row_align(*dtypes) -> int:
    """Sublane alignment of the second-minor block dim (8 f32, 16 bf16, 32 i8)."""
    item = min(jnp.dtype(d).itemsize for d in dtypes)
    return 8 * max(1, 4 // max(item, 1))


def _tensorcores_per_device() -> int:
    """1 on single-TC chips (v5e/v6e); 2 on megacore (v4/v5p) and v7x."""
    try:
        kind = jax.devices()[0].device_kind.lower()
    except Exception:
        return 1
    if any(s in kind for s in ("v5 lite", "v5e", "v6 lite", "v6e")):
        return 1
    if any(s in kind for s in ("v4", "v5p", "v7", "7x")):
        return 2
    return 1


def _cauchy_sum_kernel(x_ref, t_ref, o_ref, *, inv_gamma, valid_rows,
                       tile_rows, acc_rows, tiles_per_core, n_tiles,
                       need_mask):
    """Accumulates sum(log(1 + diff^2 / gamma)) over row tiles into o_ref."""
    c = pl.program_id(0)   # TensorCore / parallel axis
    j = pl.program_id(1)   # reduction axis over this core's row tiles

    # The output block's index_map ignores j, so it stays resident in VMEM
    # across the whole reduction axis: init once, accumulate in place.
    @pl.when(j == 0)
    def _():
        o_ref[...] = jnp.zeros_like(o_ref)

    diff = x_ref[...].astype(jnp.float32) - t_ref[...].astype(jnp.float32)
    # 0.5 * log((gamma + d^2) / gamma) == 0.5 * log(d^2 * (1/gamma) + 1).
    # Native jnp.log keeps the transcendental on the otherwise-idle EUP; the
    # divide by gamma and the 0.5 / count scaling are hoisted to the wrapper.
    val = jnp.log(diff * diff * inv_gamma + 1.0)

    m = tile_rows // acc_rows

    def partial_sum(v):
        if m > 1:
            # acc_rows // 8 independent (8, C) accumulation chains: keeps the
            # four VALU slots fed instead of one long dependent add chain.
            return v.reshape(m, acc_rows, v.shape[-1]).sum(axis=0)
        return v

    if need_mask:
        tile_idx = c * tiles_per_core + j

        # Clean tiles: unmasked accumulate (no iota / compare / select).
        @pl.when(tile_idx < n_tiles - 1)
        def _():
            o_ref[...] += partial_sum(val)

        # Last (possibly ragged) tile and clamped duplicate tiles: zero out
        # rows past the true data.  OOB garbage never propagates because
        # jnp.where lowers to a genuine select.
        @pl.when(tile_idx >= n_tiles - 1)
        def _():
            row = tile_idx * tile_rows + lax.broadcasted_iota(
                jnp.int32, val.shape, 0)
            o_ref[...] += partial_sum(jnp.where(row < valid_rows, val, 0.0))
    else:
        o_ref[...] += partial_sum(val)


def _pallas_block_sum(x2, t2, inv_gamma):
    """Sum of log(1 + diff^2 / gamma) over a 2D (R, C) view, via Pallas."""
    R, C = x2.shape
    row_align = _row_align(x2.dtype, t2.dtype)
    lanes_padded = pl.cdiv(C, LANES) * LANES

    # Biggest row tile whose lane-padded footprint stays ~TARGET_BLOCK_BYTES.
    tile_rows = (TARGET_BLOCK_BYTES // (lanes_padded * 4)) // row_align * row_align
    tile_rows = max(row_align, tile_rows)
    if tile_rows >= R:
        tile_rows = R            # single full-dim block is always legal
    n_tiles = pl.cdiv(R, tile_rows)

    num_cores = min(_tensorcores_per_device(), n_tiles)
    tiles_per_core = pl.cdiv(n_tiles, num_cores)
    need_mask = (R % tile_rows != 0) or (num_cores * tiles_per_core != n_tiles)

    # Up to eight independent (8, C) accumulator rows inside the output block.
    acc_rows = tile_rows
    if tile_rows % 8 == 0:
        for cand in (64, 32, 16, 8):
            if tile_rows % cand == 0:
                acc_rows = cand
                break

    def in_map(c, j):
        # Clamp so extra per-core iterations re-read the last tile; their
        # contribution is masked to exactly zero inside the kernel.
        return (jnp.minimum(c * tiles_per_core + j, n_tiles - 1), 0)

    kernel = functools.partial(
        _cauchy_sum_kernel,
        inv_gamma=inv_gamma,
        valid_rows=R,
        tile_rows=tile_rows,
        acc_rows=acc_rows,
        tiles_per_core=tiles_per_core,
        n_tiles=n_tiles,
        need_mask=need_mask,
    )

    partials = pl.pallas_call(
        kernel,
        out_shape=jax.ShapeDtypeStruct((num_cores * acc_rows, C), jnp.float32),
        grid_spec=pltpu.PrefetchScalarGridSpec(
            num_scalar_prefetch=0,
            grid=(num_cores, tiles_per_core),
            in_specs=[
                pl.BlockSpec((tile_rows, C), in_map),
                pl.BlockSpec((tile_rows, C), in_map),
            ],
            out_specs=pl.BlockSpec((acc_rows, C), lambda c, j: (c, 0)),
        ),
        # "parallel" enables megacore sharding of the core axis where
        # available; on v7x verify via xprof that both TensorCores are busy
        # and switch to pltpu.CORE_PARALLEL / pl.core_map if they are not.
        compiler_params=pltpu.CompilerParams(
            dimension_semantics=("parallel", "arbitrary"),
            vmem_limit_bytes=32 * 1024 * 1024,
        ),
    )(x2, t2)

    # Tiny final cross-lane reduce happens in the wrapper.
    return jnp.sum(partials)


def cauchy_loss(inputs, targets, gamma: float = 1.0):
    assert inputs.shape == targets.shape, (inputs.shape, targets.shape)
    n_elems = inputs.size
    if n_elems == 0:                       # torch.mean over empty -> nan
        return jnp.float32(jnp.nan)
    inv_gamma = 1.0 / float(gamma)

    if inputs.ndim >= 2 and inputs.shape[-1] <= MAX_BLOCK_LANES:
        # Layout-preserving collapse to (R, last_dim): keeps the original
        # minor (lane) dim so no relayout / pad copy of the operands.
        C = inputs.shape[-1]
        total = _pallas_block_sum(
            inputs.reshape(-1, C), targets.reshape(-1, C), inv_gamma)
    else:
        # Flat fallback (1-D inputs or very wide last dim): run the
        # chunk-aligned bulk through the kernel and fold the tiny
        # (< row_align*128 element) tail into the scalar with plain jnp.
        chunk = _row_align(inputs.dtype, targets.dtype) * LANES
        n_bulk = (n_elems // chunk) * chunk
        xf = inputs.reshape(-1)
        tf = targets.reshape(-1)
        total = jnp.float32(0.0)
        if n_bulk:
            total = total + _pallas_block_sum(
                xf[:n_bulk].reshape(-1, LANES),
                tf[:n_bulk].reshape(-1, LANES), inv_gamma)
        if n_bulk < n_elems:
            d = xf[n_bulk:].astype(jnp.float32) - tf[n_bulk:].astype(jnp.float32)
            total = total + jnp.sum(jnp.log(d * d * inv_gamma + 1.0))

    # Hoisted 0.5 * mean scaling.
    return total * (0.5 / n_elems)


if __name__ == "__main__":
    key = jax.random.PRNGKey(0)

    def ref_loss(x, t, gamma):
        d = x.astype(jnp.float32) - t.astype(jnp.float32)
        return jnp.mean(0.5 * jnp.log((gamma + d * d) / gamma))

    cases = [
        ((2, 4, 16, 16), 1.0),   # module's typical ND input
        ((2, 4, 16, 16), 2.5),
        ((3, 5, 7), 1.0),        # small odd shape: single full-array block
        ((5000,), 0.5),          # 1-D: kernel bulk + plain-jnp tail
    ]
    for shape, gamma in cases:
        key, k1, k2 = jax.random.split(key, 3)
        x = jax.random.normal(k1, shape, dtype=jnp.float32)
        t = jax.random.normal(k2, shape, dtype=jnp.float32)
        loss = jax.block_until_ready(cauchy_loss(x, t, gamma=gamma))
        expect = ref_loss(x, t, gamma)
        assert jnp.allclose(loss, expect, rtol=1e-5, atol=1e-6), (
            shape, gamma, loss, expect)

    print("KERNEL_OK")
</pallas_src>

<mosaic_0001>
module attributes {stable_mosaic.version = 11 : i64} {
  func.func @_cauchy_sum_kernel(%arg0: i32, %arg1: i32, %arg2: memref<128x16xf32, #tpu.memory_space<vmem>>, %arg3: memref<128x16xf32, #tpu.memory_space<vmem>>, %arg4: memref<64x16xf32, #tpu.memory_space<vmem>>) attributes {dimension_semantics = [#tpu.dimension_semantics<parallel>, #tpu.dimension_semantics<arbitrary>], iteration_bounds = array<i64: 1, 1>, scalar_prefetch = 0 : i64, scratch_operands = 0 : i64, tpu.core_type = #tpu.core_type<tc>, window_params = [{transform_indices = @transform_0, window_bounds = array<i64: 128, 16>}, {transform_indices = @transform_1, window_bounds = array<i64: 128, 16>}, {transform_indices = @transform_2, window_bounds = array<i64: 64, 16>}]} {
    %c0_i32 = arith.constant 0 : i32
    %0 = arith.cmpi eq, %arg1, %c0_i32 : i32
    %1 = arith.extui %0 : i1 to i32
    %c0_i32_0 = arith.constant 0 : i32
    %2 = arith.cmpi ne, %1, %c0_i32_0 : i32
    scf.if %2 {
      %cst_10 = arith.constant 0.000000e+00 : f32
      %17 = vector.broadcast %cst_10 : f32 to vector<64x16xf32>
      %c0_11 = arith.constant 0 : index
      %c0_12 = arith.constant 0 : index
      %18 = vector.load %arg4[%c0_11, %c0_12] : memref<64x16xf32, #tpu.memory_space<vmem>>, vector<64x16xf32>
      tpu.vector_store %arg4[%c0_11, %c0_12], %17 {strides = array<i32>} : memref<64x16xf32, #tpu.memory_space<vmem>>, vector<64x16xf32>,
    } else {
    }
    %c0 = arith.constant 0 : index
    %c0_1 = arith.constant 0 : index
    %3 = vector.load %arg2[%c0, %c0_1] : memref<128x16xf32, #tpu.memory_space<vmem>>, vector<128x16xf32>
    %c0_2 = arith.constant 0 : index
    %c0_3 = arith.constant 0 : index
    %4 = vector.load %arg3[%c0_2, %c0_3] : memref<128x16xf32, #tpu.memory_space<vmem>>, vector<128x16xf32>
    %5 = arith.subf %3, %4 : vector<128x16xf32>
    %6 = arith.mulf %5, %5 : vector<128x16xf32>
    %cst = arith.constant 1.000000e+00 : f32
    %7 = vector.broadcast %cst : f32 to vector<128x16xf32>
    %8 = arith.mulf %6, %7 : vector<128x16xf32>
    %cst_4 = arith.constant 1.000000e+00 : f32
    %9 = vector.broadcast %cst_4 : f32 to vector<128x16xf32>
    %10 = arith.addf %8, %9 : vector<128x16xf32>
    %11 = math.log %10 : vector<128x16xf32>
    %c0_5 = arith.constant 0 : index
    %c0_6 = arith.constant 0 : index
    %12 = vector.load %arg4[%c0_5, %c0_6] : memref<64x16xf32, #tpu.memory_space<vmem>>, vector<64x16xf32>
    %13 = vector.shape_cast %11 : vector<128x16xf32> to vector<2x64x16xf32>
    %cst_7 = arith.constant dense<0.000000e+00> : vector<64x16xf32>
    %14 = vector.multi_reduction <add>, %13, %cst_7 [0] : vector<2x64x16xf32> to vector<64x16xf32>
    %15 = arith.addf %12, %14 : vector<64x16xf32>
    %c0_8 = arith.constant 0 : index
    %c0_9 = arith.constant 0 : index
    %16 = vector.load %arg4[%c0_8, %c0_9] : memref<64x16xf32, #tpu.memory_space<vmem>>, vector<64x16xf32>
    tpu.vector_store %arg4[%c0_8, %c0_9], %15 {strides = array<i32>} : memref<64x16xf32, #tpu.memory_space<vmem>>, vector<64x16xf32>,
    return
  }
  func.func @transform_0(%arg0: i32, %arg1: i32) -> (i32, i32) {
    %c1_i32 = arith.constant 1 : i32
    %0 = arith.muli %arg0, %c1_i32 : i32
    %1 = arith.addi %0, %arg1 : i32
    %c0_i32 = arith.constant 0 : i32
    %2 = arith.minsi %1, %c0_i32 : i32
    %c0_i32_0 = arith.constant 0 : i32
    %c0_i32_1 = arith.constant 0 : i32
    return %2, %c0_i32_0 : i32, i32
  }
  func.func @transform_1(%arg0: i32, %arg1: i32) -> (i32, i32) {
    %c1_i32 = arith.constant 1 : i32
    %0 = arith.muli %arg0, %c1_i32 : i32
    %1 = arith.addi %0, %arg1 : i32
    %c0_i32 = arith.constant 0 : i32
    %2 = arith.minsi %1, %c0_i32 : i32
    %c0_i32_0 = arith.constant 0 : i32
    %c0_i32_1 = arith.constant 0 : i32
    return %2, %c0_i32_0 : i32, i32
  }
  func.func @transform_2(%arg0: i32, %arg1: i32) -> (i32, i32) {
    %c0_i32 = arith.constant 0 : i32
    %c0_i32_0 = arith.constant 0 : i32
    return %arg0, %c0_i32 : i32, i32
  }
}

</mosaic_0001>

<bundles_post_ra>
// kernel: tpu_custom_call.1
= control target key start
LH: loop header
LB: loop body
LE: loop exit
PB: predicated region body
PF: predicated region fallthrough
CT: control target
= control target key end

     0   :  { %vm79_vm0 = vcmask 130048   ;;  %v298_v0 = vmov 0.0   ;;  %s514_s2 = inlined_call_operand.vmem [shape: f32[64,16], index: 2, kind: output, shape index: {}]   ;;  %s515_s0 = inlined_call_operand.vmem [shape: f32[128,16], index: 0, kind: input, shape index: {}]   ;;  %s516_s1 = inlined_call_operand.vmem [shape: f32[128,16], index: 1, kind: input, shape index: {}]  }
   0x1   :  { %80 = vst.msk [vmem:[%s514_s2] sm:$0xff] %vm79_vm0, %v298_v0  ;;  %81 = vst.msk [vmem:[%s514_s2 + $0x8] sm:$0xff] %vm79_vm0, %v298_v0  ;;  %v88_v1 = vld [vmem:[%s515_s0] sm:$0xff]  ;;  %v89_v6 = vld [vmem:[%s515_s0 + $0x8] sm:$0xff] }
   0x2   :  { %82 = vst.msk [vmem:[%s514_s2 + $0x10] sm:$0xff] %vm79_vm0, %v298_v0  ;;  %83 = vst.msk [vmem:[%s514_s2 + $0x18] sm:$0xff] %vm79_vm0, %v298_v0  ;;  %v96_v2 = vld [vmem:[%s515_s0 + $0x40] sm:$0xff]  ;;  %v97_v7 = vld [vmem:[%s515_s0 + $0x48] sm:$0xff] }
   0x3   :  { %84 = vst.msk [vmem:[%s514_s2 + $0x20] sm:$0xff] %vm79_vm0, %v298_v0  ;;  %85 = vst.msk [vmem:[%s514_s2 + $0x28] sm:$0xff] %vm79_vm0, %v298_v0  ;;  %v104_v3 = vld [vmem:[%s516_s1] sm:$0xff]  ;;  %v105_v9 = vld [vmem:[%s516_s1 + $0x8] sm:$0xff] }
   0x4   :  { %86 = vst.msk [vmem:[%s514_s2 + $0x30] sm:$0xff] %vm79_vm0, %v298_v0  ;;  %87 = vst.msk [vmem:[%s514_s2 + $0x38] sm:$0xff] %vm79_vm0, %v298_v0  ;;  %v112_v4 = vld [vmem:[%s516_s1 + $0x40] sm:$0xff]  ;;  %v120_v5 = vsub.f32 %v88_v1, %v104_v3  ;;  %v113_v10 = vld [vmem:[%s516_s1 + $0x48] sm:$0xff]  ;;  %v121_v13 = vsub.f32 %v89_v6, %v105_v9 }
   0x5   :  { %v128_v8 = vsub.f32 %v96_v2, %v112_v4  ;;  %v90_v11 = vld [vmem:[%s515_s0 + $0x10] sm:$0xff]  ;;  %v129_v14 = vsub.f32 %v97_v7, %v113_v10  ;;  %v91_v21 = vld [vmem:[%s515_s0 + $0x18] sm:$0xff]  ;;  %v92_v29 = vld [vmem:[%s515_s0 + $0x20] sm:$0xff] }
   0x6   :  { %v136_v12 = vmul.f32 %v120_v5, %v120_v5  ;;  %v98_v15 = vld [vmem:[%s515_s0 + $0x50] sm:$0xff]  ;;  %v99_v22 = vld [vmem:[%s515_s0 + $0x58] sm:$0xff]  ;;  %v137_v25 = vmul.f32 %v121_v13, %v121_v13  ;;  %v100_v34 = vld [vmem:[%s515_s0 + $0x60] sm:$0xff] }
   0x7   :  { %v106_v16 = vld [vmem:[%s516_s1 + $0x10] sm:$0xff]  ;;  %v144_v18 = vmul.f32 %v128_v8, %v128_v8  ;;  %v107_v23 = vld [vmem:[%s516_s1 + $0x18] sm:$0xff]  ;;  %v145_v26 = vmul.f32 %v129_v14, %v129_v14  ;;  %v108_v35 = vld [vmem:[%s516_s1 + $0x20] sm:$0xff] }
   0x8   :  { %v114_v17 = vld [vmem:[%s516_s1 + $0x50] sm:$0xff]  ;;  %v122_v19 = vsub.f32 %v90_v11, %v106_v16  ;;  %v152_v24 = vadd.f32 1.0, %v136_v12  ;;  %v115_v27 = vld [vmem:[%s516_s1 + $0x58] sm:$0xff]  ;;  %v123_v28 = vsub.f32 %v91_v21, %v107_v23  ;;  %v116_v36 = vld [vmem:[%s516_s1 + $0x60] sm:$0xff]  ;;  %v153_v37 = vadd.f32 1.0, %v137_v25 }
   0x9   :  { %v130_v20 = vsub.f32 %v98_v15, %v114_v17  ;;  %v160_v30 = vadd.f32 1.0, %v144_v18  ;;  %v131_v33 = vsub.f32 %v99_v22, %v115_v27  ;;  %v161_v38 = vadd.f32 1.0, %v145_v26  ;;  %v93_v40 = vld [vmem:[%s515_s0 + $0x28] sm:$0xff]  ;;  %v94_v53 = vld [vmem:[%s515_s0 + $0x30] sm:$0xff]  ;;  %v95_v60 = vld [vmem:[%s515_s0 + $0x38] sm:$0xff] }
   0xa   :  { %v138_v31 = vmul.f32 %v122_v19, %v122_v19  ;;  %266 = vlog2.f32 %v152_v24  ;;  %v139_v39 = vmul.f32 %v123_v28, %v123_v28  ;;  %v101_v44 = vld [vmem:[%s515_s0 + $0x68] sm:$0xff]  ;;  %v124_v46 = vsub.f32 %v92_v29, %v108_v35  ;;  %v102_v54 = vld [vmem:[%s515_s0 + $0x70] sm:$0xff]  ;;  %v103_v0 = vld [vmem:[%s515_s0 + $0x78] sm:$0xff] }
   0xb   :  { %v146_v32 = vmul.f32 %v130_v20, %v130_v20  ;;  %268 = vlog2.f32 %v160_v30  ;;  %v147_v43 = vmul.f32 %v131_v33, %v131_v33  ;;  %v132_v47 = vsub.f32 %v100_v34, %v116_v36  ;;  %v109_v48 = vld [vmem:[%s516_s1 + $0x28] sm:$0xff]  ;;  %v110_v55 = vld [vmem:[%s516_s1 + $0x30] sm:$0xff]  ;;  %v111_v1 = vld [vmem:[%s516_s1 + $0x38] sm:$0xff] }
   0xc   :  { %v154_v41 = vadd.f32 1.0, %v138_v31  ;;  %270 = vlog2.f32 %v153_v37  ;;  %v155_v45 = vadd.f32 1.0, %v139_v39  ;;  %v117_v49 = vld [vmem:[%s516_s1 + $0x68] sm:$0xff]  ;;  %v125_v51 = vsub.f32 %v93_v40, %v109_v48  ;;  %v118_v58 = vld [vmem:[%s516_s1 + $0x70] sm:$0xff]  ;;  %v119_v2 = vld [vmem:[%s516_s1 + $0x78] sm:$0xff] }
   0xd   :  { %v162_v42 = vadd.f32 1.0, %v146_v32  ;;  %272 = vlog2.f32 %v161_v38  ;;  %v163_v50 = vadd.f32 1.0, %v147_v43  ;;  %v133_v52 = vsub.f32 %v101_v44, %v117_v49  ;;  %v200_v26 = vld [vmem:[%s514_s2] sm:$0xff]  ;;  %v201_v34 = vld [vmem:[%s514_s2 + $0x8] sm:$0xff]  ;;  %v202_v43 = vld [vmem:[%s514_s2 + $0x10] sm:$0xff] }
   0xe   :  { %274 = vlog2.f32 %v154_v41  ;;  %v140_v56 = vmul.f32 %v124_v46, %v124_v46  ;;  %v148_v57 = vmul.f32 %v132_v47, %v132_v47  ;;  %v126_v59 = vsub.f32 %v94_v53, %v110_v55 }
   0xf   :  { %276 = vlog2.f32 %v162_v42  ;;  %v141_v61 = vmul.f32 %v125_v51, %v125_v51  ;;  %v149_v62 = vmul.f32 %v133_v52, %v133_v52  ;;  %v134_v63 = vsub.f32 %v102_v54, %v118_v58  ;;  %v203_v52 = vld [vmem:[%s514_s2 + $0x18] sm:$0xff] }
  0x10   :  { %278 = vlog2.f32 %v155_v45  ;;  %v156_v3 = vadd.f32 1.0, %v140_v56  ;;  %v164_v4 = vadd.f32 1.0, %v148_v57  ;;  %v142_v5 = vmul.f32 %v126_v59, %v126_v59 }
  0x11   :  { %280 = vlog2.f32 %v163_v50  ;;  %v157_v6 = vadd.f32 1.0, %v141_v61  ;;  %v165_v7 = vadd.f32 1.0, %v149_v62  ;;  %v150_v8 = vmul.f32 %v134_v63, %v134_v63  ;;  %v204_v61 = vld [vmem:[%s514_s2 + $0x20] sm:$0xff] }
  0x12   :  { %282 = vlog2.f32 %v156_v3  ;;  %v158_v9 = vadd.f32 1.0, %v142_v5  ;;  %v127_v10 = vsub.f32 %v95_v60, %v111_v1  ;;  %v135_v11 = vsub.f32 %v103_v0, %v119_v2 }
  0x13   :  { %284 = vlog2.f32 %v164_v4  ;;  %v166_v12 = vadd.f32 1.0, %v150_v8 }
  0x14   :  { %v267_v13 = vpop.eup %266  ;;  %286 = vlog2.f32 %v157_v6  ;;  %v143_v14 = vmul.f32 %v127_v10, %v127_v10  ;;  %v151_v15 = vmul.f32 %v135_v11, %v135_v11  ;;  %v205_v6 = vld [vmem:[%s514_s2 + $0x28] sm:$0xff] }
  0x15   :  { %v269_v16 = vpop.eup %268  ;;  %v169_v17 = vmul.f32 0.6931472, %v267_v13  ;;  %288 = vlog2.f32 %v165_v7 }
  0x16   :  { %v271_v18 = vpop.eup %270  ;;  %v185_v19 = vmul.f32 0.6931472, %v269_v16  ;;  %290 = vlog2.f32 %v158_v9  ;;  %v159_v20 = vadd.f32 1.0, %v143_v14  ;;  %v167_v21 = vadd.f32 1.0, %v151_v15  ;;  %v206_v14 = vld [vmem:[%s514_s2 + $0x30] sm:$0xff] }
  0x17   :  { %v273_v22 = vpop.eup %272  ;;  %v209_v23 = vsel %vm79_vm0, %v169_v17, 0.0  ;;  %v171_v24 = vmul.f32 0.6931472, %v271_v18  ;;  %292 = vlog2.f32 %v166_v12 }
  0x18   :  { %v275_v25 = vpop.eup %274  ;;  %v210_v27 = vsel %vm79_vm0, %v185_v19, 0.0  ;;  %v187_v28 = vmul.f32 0.6931472, %v273_v22  ;;  %294 = vlog2.f32 %v159_v20  ;;  %v207_v20 = vld [vmem:[%s514_s2 + $0x38] sm:$0xff] }
  0x19   :  { %v277_v29 = vpop.eup %276  ;;  %v211_v30 = vadd.f32 %v210_v27, %v209_v23  ;;  %v212_v31 = vsel %vm79_vm0, %v171_v24, 0.0  ;;  %v173_v32 = vmul.f32 0.6931472, %v275_v25  ;;  %296 = vlog2.f32 %v167_v21 }
  0x1a   :  { %v279_v33 = vpop.eup %278  ;;  %v213_v35 = vsel %vm79_vm0, %v187_v28, 0.0  ;;  %v189_v36 = vmul.f32 0.6931472, %v277_v29 }
  0x1b   :  { %v281_v37 = vpop.eup %280  ;;  %v233_v38 = vadd.f32 %v211_v30, %v200_v26  ;;  %v214_v39 = vadd.f32 %v213_v35, %v212_v31  ;;  %v215_v40 = vsel %vm79_vm0, %v173_v32, 0.0  ;;  %v175_v41 = vmul.f32 0.6931472, %v279_v33 }
  0x1c   :  { %v283_v42 = vpop.eup %282  ;;  %v216_v44 = vsel %vm79_vm0, %v189_v36, 0.0  ;;  %v191_v45 = vmul.f32 0.6931472, %v281_v37 }
  0x1d   :  { %v285_v46 = vpop.eup %284  ;;  %241 = vst.msk [vmem:[%s514_s2] sm:$0xff] %vm79_vm0, %v233_v38  ;;  %v234_v47 = vadd.f32 %v214_v39, %v201_v34  ;;  %v217_v48 = vadd.f32 %v216_v44, %v215_v40  ;;  %v218_v49 = vsel %vm79_vm0, %v175_v41, 0.0  ;;  %v177_v50 = vmul.f32 0.6931472, %v283_v42 }
  0x1e   :  { %v287_v51 = vpop.eup %286  ;;  %v219_v53 = vsel %vm79_vm0, %v191_v45, 0.0  ;;  %v193_v54 = vmul.f32 0.6931472, %v285_v46 }
  0x1f   :  { %v289_v55 = vpop.eup %288  ;;  %242 = vst.msk [vmem:[%s514_s2 + $0x8] sm:$0xff] %vm79_vm0, %v234_v47  ;;  %v235_v56 = vadd.f32 %v217_v48, %v202_v43  ;;  %v220_v57 = vadd.f32 %v219_v53, %v218_v49  ;;  %v221_v58 = vsel %vm79_vm0, %v177_v50, 0.0  ;;  %v179_v59 = vmul.f32 0.6931472, %v287_v51 }
  0x20   :  { %v291_v60 = vpop.eup %290  ;;  %v222_v62 = vsel %vm79_vm0, %v193_v54, 0.0  ;;  %v195_v63 = vmul.f32 0.6931472, %v289_v55 }
  0x21   :  { %v293_v0 = vpop.eup %292  ;;  %243 = vst.msk [vmem:[%s514_s2 + $0x10] sm:$0xff] %vm79_vm0, %v235_v56  ;;  %v236_v1 = vadd.f32 %v220_v57, %v203_v52  ;;  %v223_v2 = vadd.f32 %v222_v62, %v221_v58  ;;  %v224_v3 = vsel %vm79_vm0, %v179_v59, 0.0  ;;  %v181_v4 = vmul.f32 0.6931472, %v291_v60 }
  0x22   :  { %v295_v5 = vpop.eup %294  ;;  %v225_v7 = vsel %vm79_vm0, %v195_v63, 0.0  ;;  %v197_v8 = vmul.f32 0.6931472, %v293_v0 }
  0x23   :  { %v297_v9 = vpop.eup %296  ;;  %244 = vst.msk [vmem:[%s514_s2 + $0x18] sm:$0xff] %vm79_vm0, %v236_v1  ;;  %v237_v10 = vadd.f32 %v223_v2, %v204_v61  ;;  %v226_v11 = vadd.f32 %v225_v7, %v224_v3  ;;  %v227_v12 = vsel %vm79_vm0, %v181_v4, 0.0  ;;  %v183_v13 = vmul.f32 0.6931472, %v295_v5 }
  0x24   :  { %v228_v15 = vsel %vm79_vm0, %v197_v8, 0.0  ;;  %v199_v16 = vmul.f32 0.6931472, %v297_v9 }
  0x25   :  { %245 = vst.msk [vmem:[%s514_s2 + $0x20] sm:$0xff] %vm79_vm0, %v237_v10  ;;  %v238_v17 = vadd.f32 %v226_v11, %v205_v6  ;;  %v229_v18 = vadd.f32 %v228_v15, %v227_v12  ;;  %v230_v19 = vsel %vm79_vm0, %v183_v13, 0.0 }
  0x26   :  { %v231_v21 = vsel %vm79_vm0, %v199_v16, 0.0 }
  0x27   :  { %246 = vst.msk [vmem:[%s514_s2 + $0x28] sm:$0xff] %vm79_vm0, %v238_v17  ;;  %v239_v22 = vadd.f32 %v229_v18, %v206_v14  ;;  %v232_v23 = vadd.f32 %v231_v21, %v230_v19 }
  0x29   :  { %247 = vst.msk [vmem:[%s514_s2 + $0x30] sm:$0xff] %vm79_vm0, %v239_v22  ;;  %v240_v24 = vadd.f32 %v232_v23, %v207_v20 }
  0x2b   :  { %248 = vst.msk [vmem:[%s514_s2 + $0x38] sm:$0xff] %vm79_vm0, %v240_v24 }

</bundles_post_ra>
